<compile_context>
chip_gen: v7x
topology: tpu7x:2x2x1
jax: 0.10.0
libtpu: 0.0.40
codegen_flags: <defaults>
</compile_context>

<pallas_src>
import functools

import jax
import jax.numpy as jnp
from jax.experimental import pallas as pl
from jax.experimental.pallas import tpu as pltpu


def _round_up(x, m):
    return ((x + m - 1) // m) * m


def flowmlp_kernel(
    x_ref,            # (TM, PD)        f32
    w1_ref, b1_ref,   # (PD, PH) wdtype, (1, PH) f32
    wh_ref, bh_ref,   # (4, PH, PH) wdtype, (4, 1, PH) f32
    wst_ref, bst_ref, # (PH, 2*PD) wdtype, (1, 2*PD) f32  (fused s|t head)
    s_ref, t_ref,     # (TM, PD) f32 each
    *, n_hidden_layers, pd,
):
    wdtype = w1_ref.dtype  # dot-operand dtype (f32 or bf16); accum is f32

    # Layer 1: input -> hidden.
    h = x_ref[...].astype(wdtype)
    y = jnp.dot(h, w1_ref[...], preferred_element_type=jnp.float32) + b1_ref[...]
    h = jnp.maximum(y, 0.0)  # f32 on the VPU

    # Hidden layers 2..5 (weights packed into one stacked array; static unroll).
    for i in range(n_hidden_layers):
        y = jnp.dot(h.astype(wdtype), wh_ref[i],
                    preferred_element_type=jnp.float32) + bh_ref[i]
        h = jnp.maximum(y, 0.0)

    # Dropout(p=0.2): identity in eval mode.

    # Fused s|t head: one MXU matmul, lane-dense (2*PD-wide) result.
    st = jnp.dot(h.astype(wdtype), wst_ref[...],
                 preferred_element_type=jnp.float32) + bst_ref[...]
    s_ref[...] = jnp.tanh(st[:, :pd]).astype(s_ref.dtype)
    t_ref[...] = st[:, pd:].astype(t_ref.dtype)


def flowmlp_forward(x, params, *, weight_dtype=jnp.bfloat16, tm=512):
    """params: flat tuple (w1,b1,...,w5,b5,ws,bs,wt,bt); weights (in,out), biases (1,out)."""
    batch, input_dim = x.shape
    (w1, b1, w2, b2, w3, b3, w4, b4, w5, b5, ws, bs, wt, bt) = params
    n_hidden = w1.shape[1]

    # Lane-pad feature dims to multiples of 128; tile the batch.
    pd = _round_up(input_dim, 128)
    ph = _round_up(n_hidden, 128)
    tm_eff = _round_up(min(tm, _round_up(batch, 8)), 8)
    b_pad = _round_up(batch, tm_eff)

    def pad_w(w, rows, cols):
        return jnp.pad(w, ((0, rows - w.shape[0]), (0, cols - w.shape[1])))

    def pad_b(b, cols):
        return jnp.pad(b, ((0, 0), (0, cols - b.shape[1])))

    # Zero-padded, packed parameters (pad weight columns AND bias entries are 0,
    # so ReLU of pad lanes is exactly 0 and cannot leak into real columns).
    x_p = jnp.pad(x.astype(jnp.float32),
                  ((0, b_pad - batch), (0, pd - input_dim)))
    w1_p = pad_w(w1, pd, ph).astype(weight_dtype)
    b1_p = pad_b(b1, ph).astype(jnp.float32)
    wh_p = jnp.stack([pad_w(w, ph, ph) for w in (w2, w3, w4, w5)]).astype(weight_dtype)
    bh_p = jnp.stack([pad_b(b, ph) for b in (b2, b3, b4, b5)]).astype(jnp.float32)
    wst_p = jnp.concatenate([pad_w(ws, ph, pd), pad_w(wt, ph, pd)],
                            axis=1).astype(weight_dtype)
    bst_p = jnp.concatenate([pad_b(bs, pd), pad_b(bt, pd)],
                            axis=1).astype(jnp.float32)

    kernel = functools.partial(flowmlp_kernel, n_hidden_layers=4, pd=pd)

    s_pad, t_pad = pl.pallas_call(
        kernel,
        out_shape=(
            jax.ShapeDtypeStruct((b_pad, pd), jnp.float32),  # s (padded)
            jax.ShapeDtypeStruct((b_pad, pd), jnp.float32),  # t (padded)
        ),
        grid_spec=pltpu.PrefetchScalarGridSpec(
            num_scalar_prefetch=0,
            grid=(b_pad // tm_eff,),
            in_specs=[
                pl.BlockSpec((tm_eff, pd), lambda i: (i, 0)),     # x tile
                pl.BlockSpec((pd, ph), lambda i: (0, 0)),         # w1 (resident)
                pl.BlockSpec((1, ph), lambda i: (0, 0)),          # b1
                pl.BlockSpec((4, ph, ph), lambda i: (0, 0, 0)),   # packed hidden W
                pl.BlockSpec((4, 1, ph), lambda i: (0, 0, 0)),    # packed hidden b
                pl.BlockSpec((ph, 2 * pd), lambda i: (0, 0)),     # fused s|t W
                pl.BlockSpec((1, 2 * pd), lambda i: (0, 0)),      # fused s|t b
            ],
            out_specs=(
                pl.BlockSpec((tm_eff, pd), lambda i: (i, 0)),
                pl.BlockSpec((tm_eff, pd), lambda i: (i, 0)),
            ),
        ),
        compiler_params=pltpu.CompilerParams(
            dimension_semantics=("parallel",),      # shard batch tiles across TCs
            vmem_limit_bytes=32 * 1024 * 1024,      # explicit; leaves headroom on v7x
        ),
    )(x_p, w1_p, b1_p, wh_p, bh_p, wst_p, bst_p)

    return s_pad[:batch, :input_dim], t_pad[:batch, :input_dim]


def init_params(key, input_dim, n_hidden):
    """Deterministic synthetic parameters (shapes match the PyTorch module)."""
    dims = [
        (input_dim, n_hidden),   # fc[0]
        (n_hidden, n_hidden),    # fc[2]
        (n_hidden, n_hidden),    # fc[4]
        (n_hidden, n_hidden),    # fc[6]
        (n_hidden, n_hidden),    # fc[8]
        (n_hidden, input_dim),   # fc_s
        (n_hidden, input_dim),   # fc_t
    ]
    params = []
    for (d_in, d_out) in dims:
        key, kw, kb = jax.random.split(key, 3)
        scale = 1.0 / jnp.sqrt(jnp.float32(d_in))
        w = jax.random.uniform(kw, (d_in, d_out), jnp.float32, -scale, scale)
        b = jax.random.uniform(kb, (1, d_out), jnp.float32, -scale, scale)
        params += [w, b]
    return tuple(params)


def flowmlp_reference(x, params):
    (w1, b1, w2, b2, w3, b3, w4, b4, w5, b5, ws, bs, wt, bt) = params
    h = x
    for w, b in ((w1, b1), (w2, b2), (w3, b3), (w4, b4), (w5, b5)):
        h = jnp.maximum(h @ w + b, 0.0)
    return jnp.tanh(h @ ws + bs), h @ wt + bt


if __name__ == "__main__":
    batch, input_dim, n_hidden = 8, 16, 32

    key = jax.random.PRNGKey(0)
    key, kx = jax.random.split(key)
    x = jax.random.normal(kx, (batch, input_dim), jnp.float32)
    params = init_params(key, input_dim, n_hidden)

    s_ref, t_ref = flowmlp_reference(x, params)

    # f32 weights: bit-level parity path (tight tolerance vs. f32 reference).
    fwd_f32 = jax.jit(functools.partial(flowmlp_forward, weight_dtype=jnp.float32))
    s, t = fwd_f32(x, params)
    jax.block_until_ready((s, t))
    assert jnp.allclose(s, s_ref, atol=1e-5, rtol=1e-5)
    assert jnp.allclose(t, t_ref, atol=1e-5, rtol=1e-5)

    # bf16 dot operands, f32 accumulation (MXU-friendly on v6e/v7x).
    fwd_bf16 = jax.jit(functools.partial(flowmlp_forward, weight_dtype=jnp.bfloat16))
    s2, t2 = fwd_bf16(x, params)
    jax.block_until_ready((s2, t2))
    assert jnp.allclose(s2, s_ref, atol=5e-2, rtol=5e-2)
    assert jnp.allclose(t2, t_ref, atol=5e-2, rtol=5e-2)

    print("KERNEL_OK")
</pallas_src>

<mosaic_0001>
module attributes {stable_mosaic.version = 11 : i64} {
  func.func @flowmlp_kernel(%arg0: i32, %arg1: memref<8x128xf32, #tpu.memory_space<vmem>>, %arg2: memref<128x128xf32, #tpu.memory_space<vmem>>, %arg3: memref<1x128xf32, #tpu.memory_space<vmem>>, %arg4: memref<4x128x128xf32, #tpu.memory_space<vmem>>, %arg5: memref<4x1x128xf32, #tpu.memory_space<vmem>>, %arg6: memref<128x256xf32, #tpu.memory_space<vmem>>, %arg7: memref<1x256xf32, #tpu.memory_space<vmem>>, %arg8: memref<8x128xf32, #tpu.memory_space<vmem>>, %arg9: memref<8x128xf32, #tpu.memory_space<vmem>>) attributes {dimension_semantics = [#tpu.dimension_semantics<parallel>], iteration_bounds = array<i64: 1>, scalar_prefetch = 0 : i64, scratch_operands = 0 : i64, tpu.core_type = #tpu.core_type<tc>, window_params = [{transform_indices = @transform_0, window_bounds = array<i64: 8, 128>}, {pipeline_mode = #tpu.pipeline_mode<synchronous>, transform_indices = @transform_1, window_bounds = array<i64: 128, 128>}, {pipeline_mode = #tpu.pipeline_mode<synchronous>, transform_indices = @transform_2, window_bounds = array<i64: 1, 128>}, {pipeline_mode = #tpu.pipeline_mode<synchronous>, transform_indices = @transform_3, window_bounds = array<i64: 4, 128, 128>}, {pipeline_mode = #tpu.pipeline_mode<synchronous>, transform_indices = @transform_4, window_bounds = array<i64: 4, 1, 128>}, {pipeline_mode = #tpu.pipeline_mode<synchronous>, transform_indices = @transform_5, window_bounds = array<i64: 128, 256>}, {pipeline_mode = #tpu.pipeline_mode<synchronous>, transform_indices = @transform_6, window_bounds = array<i64: 1, 256>}, {transform_indices = @transform_7, window_bounds = array<i64: 8, 128>}, {transform_indices = @transform_8, window_bounds = array<i64: 8, 128>}]} {
    %c0 = arith.constant 0 : index
    %c0_0 = arith.constant 0 : index
    %0 = vector.load %arg1[%c0, %c0_0] : memref<8x128xf32, #tpu.memory_space<vmem>>, vector<8x128xf32>
    %c0_1 = arith.constant 0 : index
    %c0_2 = arith.constant 0 : index
    %1 = vector.load %arg2[%c0_1, %c0_2] : memref<128x128xf32, #tpu.memory_space<vmem>>, vector<128x128xf32>
    %cst = arith.constant dense<0.000000e+00> : vector<8x128xf32>
    %2 = tpu.matmul %0, %1, %cst {dimension_numbers = #tpu.dot_dimension_numbers<[1], [0], [0], [1], [0, 0, 1, 1], [], []>} : vector<8x128xf32>, vector<128x128xf32>, vector<8x128xf32> -> vector<8x128xf32>
    %c0_3 = arith.constant 0 : index
    %c0_4 = arith.constant 0 : index
    %3 = vector.load %arg3[%c0_3, %c0_4] : memref<1x128xf32, #tpu.memory_space<vmem>>, vector<1x128xf32>
    %4 = vector.broadcast %3 : vector<1x128xf32> to vector<8x128xf32>
    %5 = arith.addf %2, %4 : vector<8x128xf32>
    %cst_5 = arith.constant 0.000000e+00 : f32
    %6 = vector.broadcast %cst_5 : f32 to vector<8x128xf32>
    %7 = arith.maximumf %5, %6 : vector<8x128xf32>
    %c0_6 = arith.constant 0 : index
    %c0_7 = arith.constant 0 : index
    %c0_8 = arith.constant 0 : index
    %8 = vector.load %arg4[%c0_6, %c0_7, %c0_8] : memref<4x128x128xf32, #tpu.memory_space<vmem>>, vector<1x128x128xf32>
    %9 = vector.shape_cast %8 : vector<1x128x128xf32> to vector<128x128xf32>
    %cst_9 = arith.constant dense<0.000000e+00> : vector<8x128xf32>
    %10 = tpu.matmul %7, %9, %cst_9 {dimension_numbers = #tpu.dot_dimension_numbers<[1], [0], [0], [1], [0, 0, 1, 1], [], []>} : vector<8x128xf32>, vector<128x128xf32>, vector<8x128xf32> -> vector<8x128xf32>
    %c0_10 = arith.constant 0 : index
    %c0_11 = arith.constant 0 : index
    %c0_12 = arith.constant 0 : index
    %11 = vector.load %arg5[%c0_10, %c0_11, %c0_12] : memref<4x1x128xf32, #tpu.memory_space<vmem>>, vector<1x1x128xf32>
    %12 = vector.shape_cast %11 : vector<1x1x128xf32> to vector<1x128xf32>
    %13 = vector.broadcast %12 : vector<1x128xf32> to vector<8x128xf32>
    %14 = arith.addf %10, %13 : vector<8x128xf32>
    %cst_13 = arith.constant 0.000000e+00 : f32
    %15 = vector.broadcast %cst_13 : f32 to vector<8x128xf32>
    %16 = arith.maximumf %14, %15 : vector<8x128xf32>
    %c1 = arith.constant 1 : index
    %c0_14 = arith.constant 0 : index
    %c0_15 = arith.constant 0 : index
    %17 = vector.load %arg4[%c1, %c0_14, %c0_15] : memref<4x128x128xf32, #tpu.memory_space<vmem>>, vector<1x128x128xf32>
    %18 = vector.shape_cast %17 : vector<1x128x128xf32> to vector<128x128xf32>
    %cst_16 = arith.constant dense<0.000000e+00> : vector<8x128xf32>
    %19 = tpu.matmul %16, %18, %cst_16 {dimension_numbers = #tpu.dot_dimension_numbers<[1], [0], [0], [1], [0, 0, 1, 1], [], []>} : vector<8x128xf32>, vector<128x128xf32>, vector<8x128xf32> -> vector<8x128xf32>
    %c1_17 = arith.constant 1 : index
    %c0_18 = arith.constant 0 : index
    %c0_19 = arith.constant 0 : index
    %20 = vector.load %arg5[%c1_17, %c0_18, %c0_19] : memref<4x1x128xf32, #tpu.memory_space<vmem>>, vector<1x1x128xf32>
    %21 = vector.shape_cast %20 : vector<1x1x128xf32> to vector<1x128xf32>
    %22 = vector.broadcast %21 : vector<1x128xf32> to vector<8x128xf32>
    %23 = arith.addf %19, %22 : vector<8x128xf32>
    %cst_20 = arith.constant 0.000000e+00 : f32
    %24 = vector.broadcast %cst_20 : f32 to vector<8x128xf32>
    %25 = arith.maximumf %23, %24 : vector<8x128xf32>
    %c2 = arith.constant 2 : index
    %c0_21 = arith.constant 0 : index
    %c0_22 = arith.constant 0 : index
    %26 = vector.load %arg4[%c2, %c0_21, %c0_22] : memref<4x128x128xf32, #tpu.memory_space<vmem>>, vector<1x128x128xf32>
    %27 = vector.shape_cast %26 : vector<1x128x128xf32> to vector<128x128xf32>
    %cst_23 = arith.constant dense<0.000000e+00> : vector<8x128xf32>
    %28 = tpu.matmul %25, %27, %cst_23 {dimension_numbers = #tpu.dot_dimension_numbers<[1], [0], [0], [1], [0, 0, 1, 1], [], []>} : vector<8x128xf32>, vector<128x128xf32>, vector<8x128xf32> -> vector<8x128xf32>
    %c2_24 = arith.constant 2 : index
    %c0_25 = arith.constant 0 : index
    %c0_26 = arith.constant 0 : index
    %29 = vector.load %arg5[%c2_24, %c0_25, %c0_26] : memref<4x1x128xf32, #tpu.memory_space<vmem>>, vector<1x1x128xf32>
    %30 = vector.shape_cast %29 : vector<1x1x128xf32> to vector<1x128xf32>
    %31 = vector.broadcast %30 : vector<1x128xf32> to vector<8x128xf32>
    %32 = arith.addf %28, %31 : vector<8x128xf32>
    %cst_27 = arith.constant 0.000000e+00 : f32
    %33 = vector.broadcast %cst_27 : f32 to vector<8x128xf32>
    %34 = arith.maximumf %32, %33 : vector<8x128xf32>
    %c3 = arith.constant 3 : index
    %c0_28 = arith.constant 0 : index
    %c0_29 = arith.constant 0 : index
    %35 = vector.load %arg4[%c3, %c0_28, %c0_29] : memref<4x128x128xf32, #tpu.memory_space<vmem>>, vector<1x128x128xf32>
    %36 = vector.shape_cast %35 : vector<1x128x128xf32> to vector<128x128xf32>
    %cst_30 = arith.constant dense<0.000000e+00> : vector<8x128xf32>
    %37 = tpu.matmul %34, %36, %cst_30 {dimension_numbers = #tpu.dot_dimension_numbers<[1], [0], [0], [1], [0, 0, 1, 1], [], []>} : vector<8x128xf32>, vector<128x128xf32>, vector<8x128xf32> -> vector<8x128xf32>
    %c3_31 = arith.constant 3 : index
    %c0_32 = arith.constant 0 : index
    %c0_33 = arith.constant 0 : index
    %38 = vector.load %arg5[%c3_31, %c0_32, %c0_33] : memref<4x1x128xf32, #tpu.memory_space<vmem>>, vector<1x1x128xf32>
    %39 = vector.shape_cast %38 : vector<1x1x128xf32> to vector<1x128xf32>
    %40 = vector.broadcast %39 : vector<1x128xf32> to vector<8x128xf32>
    %41 = arith.addf %37, %40 : vector<8x128xf32>
    %cst_34 = arith.constant 0.000000e+00 : f32
    %42 = vector.broadcast %cst_34 : f32 to vector<8x128xf32>
    %43 = arith.maximumf %41, %42 : vector<8x128xf32>
    %c0_35 = arith.constant 0 : index
    %c0_36 = arith.constant 0 : index
    %44 = vector.load %arg6[%c0_35, %c0_36] : memref<128x256xf32, #tpu.memory_space<vmem>>, vector<128x256xf32>
    %cst_37 = arith.constant dense<0.000000e+00> : vector<8x256xf32>
    %45 = tpu.matmul %43, %44, %cst_37 {dimension_numbers = #tpu.dot_dimension_numbers<[1], [0], [0], [1], [0, 0, 1, 1], [], []>} : vector<8x128xf32>, vector<128x256xf32>, vector<8x256xf32> -> vector<8x256xf32>
    %c0_38 = arith.constant 0 : index
    %c0_39 = arith.constant 0 : index
    %46 = vector.load %arg7[%c0_38, %c0_39] : memref<1x256xf32, #tpu.memory_space<vmem>>, vector<1x256xf32>
    %47 = vector.broadcast %46 : vector<1x256xf32> to vector<8x256xf32>
    %48 = arith.addf %45, %47 : vector<8x256xf32>
    %49 = vector.extract_strided_slice %48 {offsets = [0, 0], sizes = [8, 128], strides = [1, 1]} : vector<8x256xf32> to vector<8x128xf32>
    %50 = math.tanh %49 : vector<8x128xf32>
    %c0_40 = arith.constant 0 : index
    %c0_41 = arith.constant 0 : index
    %51 = vector.load %arg8[%c0_40, %c0_41] : memref<8x128xf32, #tpu.memory_space<vmem>>, vector<8x128xf32>
    tpu.vector_store %arg8[%c0_40, %c0_41], %50 {strides = array<i32>} : memref<8x128xf32, #tpu.memory_space<vmem>>, vector<8x128xf32>,
    %52 = vector.extract_strided_slice %48 {offsets = [0, 128], sizes = [8, 128], strides = [1, 1]} : vector<8x256xf32> to vector<8x128xf32>
    %c0_42 = arith.constant 0 : index
    %c0_43 = arith.constant 0 : index
    %53 = vector.load %arg9[%c0_42, %c0_43] : memref<8x128xf32, #tpu.memory_space<vmem>>, vector<8x128xf32>
    tpu.vector_store %arg9[%c0_42, %c0_43], %52 {strides = array<i32>} : memref<8x128xf32, #tpu.memory_space<vmem>>, vector<8x128xf32>,
    return
  }
  func.func @transform_0(%arg0: i32) -> (i32, i32) {
    %c0_i32 = arith.constant 0 : i32
    %c0_i32_0 = arith.constant 0 : i32
    return %arg0, %c0_i32 : i32, i32
  }
  func.func @transform_1(%arg0: i32) -> (i32, i32) {
    %c0_i32 = arith.constant 0 : i32
    %c0_i32_0 = arith.constant 0 : i32
    %c0_i32_1 = arith.constant 0 : i32
    return %c0_i32, %c0_i32_0 : i32, i32
  }
  func.func @transform_2(%arg0: i32) -> (i32, i32) {
    %c0_i32 = arith.constant 0 : i32
    %c0_i32_0 = arith.constant 0 : i32
    %c0_i32_1 = arith.constant 0 : i32
    return %c0_i32, %c0_i32_0 : i32, i32
  }
  func.func @transform_3(%arg0: i32) -> (i32, i32, i32) {
    %c0_i32 = arith.constant 0 : i32
    %c0_i32_0 = arith.constant 0 : i32
    %c0_i32_1 = arith.constant 0 : i32
    %c0_i32_2 = arith.constant 0 : i32
    return %c0_i32, %c0_i32_0, %c0_i32_1 : i32, i32, i32
  }
  func.func @transform_4(%arg0: i32) -> (i32, i32, i32) {
    %c0_i32 = arith.constant 0 : i32
    %c0_i32_0 = arith.constant 0 : i32
    %c0_i32_1 = arith.constant 0 : i32
    %c0_i32_2 = arith.constant 0 : i32
    return %c0_i32, %c0_i32_0, %c0_i32_1 : i32, i32, i32
  }
  func.func @transform_5(%arg0: i32) -> (i32, i32) {
    %c0_i32 = arith.constant 0 : i32
    %c0_i32_0 = arith.constant 0 : i32
    %c0_i32_1 = arith.constant 0 : i32
    return %c0_i32, %c0_i32_0 : i32, i32
  }
  func.func @transform_6(%arg0: i32) -> (i32, i32) {
    %c0_i32 = arith.constant 0 : i32
    %c0_i32_0 = arith.constant 0 : i32
    %c0_i32_1 = arith.constant 0 : i32
    return %c0_i32, %c0_i32_0 : i32, i32
  }
  func.func @transform_7(%arg0: i32) -> (i32, i32) {
    %c0_i32 = arith.constant 0 : i32
    %c0_i32_0 = arith.constant 0 : i32
    return %arg0, %c0_i32 : i32, i32
  }
  func.func @transform_8(%arg0: i32) -> (i32, i32) {
    %c0_i32 = arith.constant 0 : i32
    %c0_i32_0 = arith.constant 0 : i32
    return %arg0, %c0_i32 : i32, i32
  }
}

</mosaic_0001>

<bundles_post_ra>
// kernel: flowmlp_forward.1
= control target key start
LH: loop header
LB: loop body
LE: loop exit
PB: predicated region body
PF: predicated region fallthrough
CT: control target
= control target key end

     0   :  { %14 = vsyncpa [#allocation3], 0  ;;  %v1176_v3 = vmov 0.0|0.0   ;;  %vm1177_vm0 = vmmov 0   ;;  %v1178_v6 = vmov 0.0   ;;  %s1658_s0 = inlined_call_operand.vmem [shape: f32[8,128], index: 0, kind: input, shape index: {}]   ;;  %s1659_s1 = inlined_call_operand.vmem [shape: f32[128,128], index: 1, kind: input, shape index: {}]   ;;  %s1660_s2 = inlined_call_operand.vmem [shape: f32[1,128], index: 2, kind: input, shape index: {}]   ;;  %s1661_s3 = inlined_call_operand.vmem [shape: f32[4,128,128], index: 3, kind: input, shape index: {}]   ;;  %s1662_s4 = inlined_call_operand.vmem [shape: f32[4,1,128], index: 4, kind: input, shape index: {}]   ;;  %s1663_s5 = inlined_call_operand.vmem [shape: f32[128,256], index: 5, kind: input, shape index: {}]   ;;  %s1664_s6 = inlined_call_operand.vmem [shape: f32[1,256], index: 6, kind: input, shape index: {}]   ;;  %s1665_s7 = inlined_call_operand.hbm [shape: f32[8,128], index: 7, kind: output, shape index: {0}]   ;;  %s1666_s8 = inlined_call_operand.hbm [shape: f32[8,128], index: 8, kind: output, shape index: {1}]  }
   0x1   :  { %v31_v0 = vld [vmem:[%s1659_s1] sm:$0xff]  ;;  %v32_v1 = vld [vmem:[%s1659_s1 + $0x8] sm:$0xff]  ;;  %v33_v2 = vld [vmem:[%s1659_s1 + $0x10] sm:$0xff]  ;;  %969 = vmatprep.subr.bf16.mxu0 %v1176_v3  ;;  %826 = vmatprep.mubr.msk.f32.mxu0 %vm1177_vm0, %v1178_v6 }
   0x2   :  { %v970_v4 = vpack.c.bf16 %v32_v1, %v31_v0  ;;  %v34_v5 = vld [vmem:[%s1659_s1 + $0x18] sm:$0xff]  ;;  %993 = vmatprep.subr.bf16.mxu1 %v1176_v3  ;;  %861 = vmatprep.mubr.msk.f32.mxu1 %vm1177_vm0, %v1178_v6  ;;  %v35_v8 = vld [vmem:[%s1659_s1 + $0x20] sm:$0xff]  ;;  %v36_v9 = vld [vmem:[%s1659_s1 + $0x28] sm:$0xff] }
   0x3   :  { %v973_v7 = vpack.c.bf16 %v34_v5, %v33_v2  ;;  %v125_v10 = vld [vmem:[%s1661_s3] sm:$0xff]  ;;  %v126_v11 = vld [vmem:[%s1661_s3 + $0x8] sm:$0xff]  ;;  %v127_v12 = vld [vmem:[%s1661_s3 + $0x10] sm:$0xff]  ;;  %v976_v14 = vpack.c.bf16 %v36_v9, %v35_v8 }
   0x4   :  { %971 = vmatpush3.bf16.msra.mxu0 %v970_v4  ;;  %v128_v13 = vld [vmem:[%s1661_s3 + $0x18] sm:$0xff]  ;;  %v994_v15 = vpack.c.bf16 %v126_v11, %v125_v10  ;;  %v37_v16 = vld [vmem:[%s1659_s1 + $0x30] sm:$0xff]  ;;  %v129_v19 = vld [vmem:[%s1661_s3 + $0x20] sm:$0xff] }
   0x5   :  { %972 = vmatprep.subr.bf16.mxu0 %v1176_v3  ;;  %v38_v17 = vld [vmem:[%s1659_s1 + $0x38] sm:$0xff]  ;;  %v997_v18 = vpack.c.bf16 %v128_v13, %v127_v12  ;;  %v130_v20 = vld [vmem:[%s1661_s3 + $0x28] sm:$0xff] }
   0x6   :  { %995 = vmatpush3.bf16.msra.mxu1 %v994_v15 }
   0x7   :  { %996 = vmatprep.subr.bf16.mxu1 %v1176_v3 }
   0x8   :  { %974 = vmatpush3.bf16.msra.mxu0 %v973_v7 }
   0x9   :  { %975 = vmatprep.subr.bf16.mxu0 %v1176_v3 }
   0xa   :  { %15 = vsyncpa [#allocation5], 0  ;;  %v979_v21 = vpack.c.bf16 %v38_v17, %v37_v16  ;;  %v39_v22 = vld [vmem:[%s1659_s1 + $0x40] sm:$0xff]  ;;  %v40_v23 = vld [vmem:[%s1659_s1 + $0x48] sm:$0xff]  ;;  %998 = vmatpush3.bf16.msra.mxu1 %v997_v18  ;;  %v1000_v24 = vpack.c.bf16 %v130_v20, %v129_v19 }
   0xb   :  { %999 = vmatprep.subr.bf16.mxu1 %v1176_v3  ;;  %v131_v25 = vld [vmem:[%s1661_s3 + $0x30] sm:$0xff]  ;;  %v132_v26 = vld [vmem:[%s1661_s3 + $0x38] sm:$0xff]  ;;  %v982_v27 = vpack.c.bf16 %v40_v23, %v39_v22  ;;  %v133_v31 = vld [vmem:[%s1661_s3 + $0x40] sm:$0xff] }
   0xc   :  { %977 = vmatpush3.bf16.msra.mxu0 %v976_v14  ;;  %v41_v28 = vld [vmem:[%s1659_s1 + $0x50] sm:$0xff]  ;;  %v42_v29 = vld [vmem:[%s1659_s1 + $0x58] sm:$0xff]  ;;  %v1003_v30 = vpack.c.bf16 %v132_v26, %v131_v25  ;;  %v134_v32 = vld [vmem:[%s1661_s3 + $0x48] sm:$0xff] }
   0xd   :  { %978 = vmatprep.subr.bf16.mxu0 %v1176_v3  ;;  %v985_v33 = vpack.c.bf16 %v42_v29, %v41_v28  ;;  %v43_v34 = vld [vmem:[%s1659_s1 + $0x60] sm:$0xff]  ;;  %v44_v35 = vld [vmem:[%s1659_s1 + $0x68] sm:$0xff]  ;;  %v1006_v36 = vpack.c.bf16 %v134_v32, %v133_v31  ;;  %v135_v37 = vld [vmem:[%s1661_s3 + $0x50] sm:$0xff] }
   0xe   :  { %1001 = vmatpush3.bf16.msra.mxu1 %v1000_v24  ;;  %v136_v38 = vld [vmem:[%s1661_s3 + $0x58] sm:$0xff]  ;;  %v988_v39 = vpack.c.bf16 %v44_v35, %v43_v34  ;;  %v45_v40 = vld [vmem:[%s1659_s1 + $0x70] sm:$0xff]  ;;  %v137_v43 = vld [vmem:[%s1661_s3 + $0x60] sm:$0xff] }
   0xf   :  { %1002 = vmatprep.subr.bf16.mxu1 %v1176_v3  ;;  %v46_v41 = vld [vmem:[%s1659_s1 + $0x78] sm:$0xff]  ;;  %v1009_v42 = vpack.c.bf16 %v136_v38, %v135_v37  ;;  %v138_v44 = vld [vmem:[%s1661_s3 + $0x68] sm:$0xff]  ;;  %v30_v47 = vld [vmem:[%s1658_s0] sm:$0xff] }
  0x10   :  { %980 = vmatpush3.bf16.msra.mxu0 %v979_v21  ;;  %v991_v45 = vpack.c.bf16 %v46_v41, %v45_v40  ;;  %v1012_v46 = vpack.c.bf16 %v138_v44, %v137_v43  ;;  %v139_v48 = vld [vmem:[%s1661_s3 + $0x70] sm:$0xff]  ;;  %v140_v49 = vld [vmem:[%s1661_s3 + $0x78] sm:$0xff]  ;;  %v655_v51 = vld [vmem:[%s1661_s3 + $0x80] sm:$0xff] }
  0x11   :  { %981 = vmatprep.subr.bf16.mxu0 %v1176_v3  ;;  %v1015_v50 = vpack.c.bf16 %v140_v49, %v139_v48  ;;  %v656_v52 = vld [vmem:[%s1661_s3 + $0x88] sm:$0xff]  ;;  %v657_v53 = vld [vmem:[%s1661_s3 + $0x90] sm:$0xff]  ;;  %v658_v55 = vld [vmem:[%s1661_s3 + $0x98] sm:$0xff] }
  0x12   :  { %1004 = vmatpush3.bf16.msra.mxu1 %v1003_v30  ;;  %v1018_v54 = vpack.c.bf16 %v656_v52, %v655_v51  ;;  %v1021_v56 = vpack.c.bf16 %v658_v55, %v657_v53  ;;  %v659_v57 = vld [vmem:[%s1661_s3 + $0xa0] sm:$0xff]  ;;  %v660_v58 = vld [vmem:[%s1661_s3 + $0xa8] sm:$0xff]  ;;  %v661_v60 = vld [vmem:[%s1661_s3 + $0xb0] sm:$0xff] }
  0x13   :  { %1005 = vmatprep.subr.bf16.mxu1 %v1176_v3  ;;  %v1024_v59 = vpack.c.bf16 %v660_v58, %v659_v57  ;;  %v662_v61 = vld [vmem:[%s1661_s3 + $0xb8] sm:$0xff]  ;;  %v663_v63 = vld [vmem:[%s1661_s3 + $0xc0] sm:$0xff]  ;;  %v664_v0 = vld [vmem:[%s1661_s3 + $0xc8] sm:$0xff] }
  0x14   :  { %983 = vmatpush3.bf16.msra.mxu0 %v982_v27  ;;  %v1027_v62 = vpack.c.bf16 %v662_v61, %v661_v60  ;;  %v1030_v1 = vpack.c.bf16 %v664_v0, %v663_v63  ;;  %v665_v2 = vld [vmem:[%s1661_s3 + $0xd0] sm:$0xff]  ;;  %v666_v4 = vld [vmem:[%s1661_s3 + $0xd8] sm:$0xff]  ;;  %v667_v7 = vld [vmem:[%s1661_s3 + $0xe0] sm:$0xff] }
  0x15   :  { %984 = vmatprep.subr.bf16.mxu0 %v1176_v3  ;;  %v1033_v5 = vpack.c.bf16 %v666_v4, %v665_v2  ;;  %v668_v8 = vld [vmem:[%s1661_s3 + $0xe8] sm:$0xff]  ;;  %v653_v10 = vld [vmem:[%s1660_s2] ss:$0 sm:$0xff]  ;;  %v669_v15 = vld [vmem:[%s1661_s3 + $0xf0] sm:$0xff] }
  0x16   :  { %1007 = vmatpush3.bf16.msra.mxu1 %v1006_v36  ;;  %v1036_v9 = vpack.c.bf16 %v668_v8, %v667_v7  ;;  %v670_v16 = vld [vmem:[%s1661_s3 + $0xf8] sm:$0xff]  ;;  %v673_v18 = vld [vmem:[%s1661_s3 + $0x100] sm:$0xff]  ;;  %v674_v19 = vld [vmem:[%s1661_s3 + $0x108] sm:$0xff] }
  0x17   :  { %1008 = vmatprep.subr.bf16.mxu1 %v1176_v3  ;;  %v1039_v17 = vpack.c.bf16 %v670_v16, %v669_v15  ;;  %v675_v20 = vld [vmem:[%s1661_s3 + $0x110] sm:$0xff]  ;;  %v1042_v21 = vpack.c.bf16 %v674_v19, %v673_v18  ;;  %v676_v22 = vld [vmem:[%s1661_s3 + $0x118] sm:$0xff]  ;;  %v677_v24 = vld [vmem:[%s1661_s3 + $0x120] sm:$0xff] }
  0x18   :  { %986 = vmatpush3.bf16.msra.mxu0 %v985_v33  ;;  %v1045_v23 = vpack.c.bf16 %v676_v22, %v675_v20  ;;  %v678_v25 = vld [vmem:[%s1661_s3 + $0x128] sm:$0xff]  ;;  %v679_v27 = vld [vmem:[%s1661_s3 + $0x130] sm:$0xff]  ;;  %v680_v28 = vld [vmem:[%s1661_s3 + $0x138] sm:$0xff] }
  0x19   :  { %987 = vmatprep.subr.bf16.mxu0 %v1176_v3  ;;  %v1048_v26 = vpack.c.bf16 %v678_v25, %v677_v24  ;;  %v1051_v29 = vpack.c.bf16 %v680_v28, %v679_v27  ;;  %v681_v30 = vld [vmem:[%s1661_s3 + $0x140] sm:$0xff]  ;;  %v682_v31 = vld [vmem:[%s1661_s3 + $0x148] sm:$0xff]  ;;  %v683_v33 = vld [vmem:[%s1661_s3 + $0x150] sm:$0xff] }
  0x1a   :  { %1010 = vmatpush3.bf16.msra.mxu1 %v1009_v42  ;;  %v1054_v32 = vpack.c.bf16 %v682_v31, %v681_v30  ;;  %v684_v34 = vld [vmem:[%s1661_s3 + $0x158] sm:$0xff]  ;;  %v685_v36 = vld [vmem:[%s1661_s3 + $0x160] sm:$0xff]  ;;  %v686_v37 = vld [vmem:[%s1661_s3 + $0x168] sm:$0xff] }
  0x1b   :  { %1011 = vmatprep.subr.bf16.mxu1 %v1176_v3  ;;  %v1057_v35 = vpack.c.bf16 %v684_v34, %v683_v33  ;;  %v1060_v38 = vpack.c.bf16 %v686_v37, %v685_v36  ;;  %v687_v44 = vld [vmem:[%s1661_s3 + $0x170] sm:$0xff]  ;;  %v692_v48 = vld [vmem:[%s1661_s3 + $0x188] sm:$0xff]  ;;  %v694_v51 = vld [vmem:[%s1661_s3 + $0x198] sm:$0xff] }
  0x1c   :  { %989 = vmatpush3.bf16.msra.mxu0 %v988_v39  ;;  %v654_v39 = vld [vmem:[%s1662_s4] ss:$0 sm:$0xff]  ;;  %v693_v49 = vld [vmem:[%s1661_s3 + $0x190] sm:$0xff]  ;;  %v698_v57 = vld [vmem:[%s1661_s3 + $0x1b8] sm:$0xff] }
  0x1d   :  { %990 = vmatprep.subr.bf16.mxu0 %v1176_v3  ;;  %v1069_v52 = vpack.c.bf16 %v694_v51, %v693_v49  ;;  %v695_v53 = vld [vmem:[%s1661_s3 + $0x1a0] sm:$0xff]  ;;  %v700_v60 = vld [vmem:[%s1661_s3 + $0x1c8] sm:$0xff]  ;;  %v702_v63 = vld [vmem:[%s1661_s3 + $0x1d8] sm:$0xff] }
  0x1e   :  { %1013 = vmatpush3.bf16.msra.mxu1 %v1012_v46  ;;  %v704_v2 = vld [vmem:[%s1661_s3 + $0x1e8] sm:$0xff]  ;;  %v509_v16 = vld [vmem:[%s1663_s5 + $0x10] sm:$0xff]  ;;  %v514_v18 = vld [vmem:[%s1663_s5 + $0x38] sm:$0xff] }
  0x1f   :  { %1014 = vmatprep.subr.bf16.mxu1 %v1176_v3  ;;  %v513_v22 = vld [vmem:[%s1663_s5 + $0x30] sm:$0xff]  ;;  %v518_v24 = vld [vmem:[%s1663_s5 + $0x58] sm:$0xff]  ;;  %v515_v27 = vld [vmem:[%s1663_s5 + $0x40] sm:$0xff] }
  0x20   :  { %992 = vmatpush3.bf16.msra.mxu0 %v991_v45  ;;  %v688_v45 = vld [vmem:[%s1661_s3 + $0x178] sm:$0xff]  ;;  %v517_v28 = vld [vmem:[%s1663_s5 + $0x50] sm:$0xff]  ;;  %v519_v33 = vld [vmem:[%s1663_s5 + $0x60] sm:$0xff] }
  0x21   :  { %1017 = vmatprep.subr.bf16.mxu0 %v1176_v3  ;;  %v1063_v46 = vpack.c.bf16 %v688_v45, %v687_v44  ;;  %v522_v30 = vld [vmem:[%s1663_s5 + $0x78] sm:$0xff]  ;;  %v1099_v31 = vpack.c.bf16 %v517_v28, %v515_v27  ;;  %v521_v34 = vld [vmem:[%s1663_s5 + $0x70] sm:$0xff]  ;;  %v527_v45 = vld [vmem:[%s1663_s5 + $0xa0] sm:$0xff] }
  0x22   :  { %1016 = vmatpush3.bf16.msra.mxu1 %v1015_v50  ;;  %v526_v36 = vld [vmem:[%s1663_s5 + $0x98] sm:$0xff]  ;;  %v1103_v37 = vpack.c.bf16 %v521_v34, %v519_v33  ;;  %v531_v51 = vld [vmem:[%s1663_s5 + $0xc0] sm:$0xff] }
  0x23   :  { %827 = vmatmul.mubr.f32.vlgmr.msra.gmra.mrb[0].mxu0 %v30_v47  ;;  %1041 = vmatprep.subr.bf16.mxu1 %v1176_v3  ;;  %v691_v47 = vld [vmem:[%s1661_s3 + $0x180] sm:$0xff] }
  0x24   :  { %896 = vmatprep.mubr.msk.f32.mxu0 %vm1177_vm0, %v1178_v6  ;;  %1019 = vmatpush3.bf16.msra.mxu0 %v1018_v54  ;;  %v1066_v50 = vpack.c.bf16 %v692_v48, %v691_v47  ;;  %v696_v54 = vld [vmem:[%s1661_s3 + $0x1a8] sm:$0xff]  ;;  %v534_v48 = vld [vmem:[%s1663_s5 + $0xd8] sm:$0xff] }
  0x25   :  { %1020 = vmatprep.subr.bf16.mxu0 %v1176_v3  ;;  %v1072_v55 = vpack.c.bf16 %v696_v54, %v695_v53  ;;  %v532_v47 = vld [vmem:[%s1663_s5 + $0xc8] sm:$0xff]  ;;  %v690_v54 = vld [vmem:[%s1662_s4 + $0x2] ss:$0 sm:$0xff] }
  0x28   :  { %1022 = vmatpush3.bf16.msra.mxu0 %v1021_v56  ;;  %v697_v56 = vld [vmem:[%s1661_s3 + $0x1b0] sm:$0xff] }
  0x29   :  { %1023 = vmatprep.subr.bf16.mxu0 %v1176_v3  ;;  %v1075_v58 = vpack.c.bf16 %v698_v57, %v697_v56 }
  0x2c   :  { %1025 = vmatpush3.bf16.msra.mxu0 %v1024_v59  ;;  %v699_v59 = vld [vmem:[%s1661_s3 + $0x1c0] sm:$0xff] }
  0x2d   :  { %1026 = vmatprep.subr.bf16.mxu0 %v1176_v3  ;;  %v1078_v61 = vpack.c.bf16 %v700_v60, %v699_v59  ;;  %v536_v59 = vld [vmem:[%s1663_s5 + $0xe8] sm:$0xff]  ;;  %v538_v60 = vld [vmem:[%s1663_s5 + $0xf8] sm:$0xff] }
  0x30   :  { %1028 = vmatpush3.bf16.msra.mxu0 %v1027_v62  ;;  %v701_v62 = vld [vmem:[%s1661_s3 + $0x1d0] sm:$0xff] }
  0x31   :  { %1029 = vmatprep.subr.bf16.mxu0 %v1176_v3  ;;  %v1081_v0 = vpack.c.bf16 %v702_v63, %v701_v62  ;;  %v535_v62 = vld [vmem:[%s1663_s5 + $0xe0] sm:$0xff]  ;;  %v537_v63 = vld [vmem:[%s1663_s5 + $0xf0] sm:$0xff] }
  0x34   :  { %1031 = vmatpush3.bf16.msra.mxu0 %v1030_v1  ;;  %v703_v1 = vld [vmem:[%s1661_s3 + $0x1e0] sm:$0xff] }
  0x35   :  { %1032 = vmatprep.subr.bf16.mxu0 %v1176_v3  ;;  %v1084_v4 = vpack.c.bf16 %v704_v2, %v703_v1  ;;  %v708_v1 = vld [vmem:[%s1662_s4 + $0x3] ss:$0 sm:$0xff] }
  0x38   :  { %1034 = vmatpush3.bf16.msra.mxu0 %v1033_v5  ;;  %v672_v5 = vld [vmem:[%s1662_s4 + $0x1] ss:$0 sm:$0xff] }
  0x39   :  { %1035 = vmatprep.subr.bf16.mxu0 %v1176_v3 }
  0x3c   :  { %1037 = vmatpush3.bf16.msra.mxu0 %v1036_v9 }
  0x3d   :  { %1038 = vmatprep.subr.bf16.mxu0 %v1176_v3 }
  0x40   :  { %1040 = vmatpush3.bf16.msra.mxu0 %v1039_v17  ;;  %v512_v17 = vld [vmem:[%s1663_s5 + $0x28] sm:$0xff] }
  0x41   :  { %1065 = vmatprep.subr.bf16.mxu0 %v1176_v3  ;;  %v1093_v20 = vpack.c.bf16 %v514_v18, %v512_v17 }
  0xf6   :  { %v120_v11 = vpop.f32.mrb[0].mxu0 }
  0xf7   :  { %v121_v12 = vadd.f32 %v653_v10, %v120_v11  ;;  %v828_v13 = vpop.f32.mrb[1].mxu0  ;;  %v705_v11 = vld [vmem:[%s1661_s3 + $0x1f0] sm:$0xff] }
  0xf8   :  { %v508_v13 = vld [vmem:[%s1663_s5 + $0x8] sm:$0xff] }
  0xf9   :  { %v124_v14 = vmax.f32 %v121_v12, 0.0  ;;  %v706_v12 = vld [vmem:[%s1661_s3 + $0x1f8] sm:$0xff] }
  0xfb   :  { %862 = vmatmul.mubr.f32.vlgmr.msra.gmra.mrb[0].mxu1 %v124_v14  ;;  %v510_v14 = vld [vmem:[%s1663_s5 + $0x18] sm:$0xff] }
  0xfc   :  { %931 = vmatprep.mubr.msk.f32.mxu1 %vm1177_vm0, %v1178_v6  ;;  %1043 = vmatpush3.bf16.msra.mxu1 %v1042_v21  ;;  %v1089_v15 = vpack.c.bf16 %v510_v14, %v508_v13  ;;  %v511_v21 = vld [vmem:[%s1663_s5 + $0x20] sm:$0xff] }
  0xfd   :  { %1044 = vmatprep.subr.bf16.mxu1 %v1176_v3  ;;  %v1095_v25 = vpack.c.bf16 %v513_v22, %v511_v21 }
 0x100   :  { %1046 = vmatpush3.bf16.msra.mxu1 %v1045_v23  ;;  %v516_v23 = vld [vmem:[%s1663_s5 + $0x48] sm:$0xff] }
 0x101   :  { %1047 = vmatprep.subr.bf16.mxu1 %v1176_v3 }
 0x104   :  { %1049 = vmatpush3.bf16.msra.mxu1 %v1048_v26  ;;  %v1097_v26 = vpack.c.bf16 %v518_v24, %v516_v23 }
 0x105   :  { %1050 = vmatprep.subr.bf16.mxu1 %v1176_v3 }
 0x108   :  { %1052 = vmatpush3.bf16.msra.mxu1 %v1051_v29  ;;  %v520_v29 = vld [vmem:[%s1663_s5 + $0x68] sm:$0xff] }
 0x109   :  { %1053 = vmatprep.subr.bf16.mxu1 %v1176_v3 }
 0x10c   :  { %1055 = vmatpush3.bf16.msra.mxu1 %v1054_v32  ;;  %v1101_v32 = vpack.c.bf16 %v522_v30, %v520_v29 }
 0x10d   :  { %1056 = vmatprep.subr.bf16.mxu1 %v1176_v3 }
 0x110   :  { %1058 = vmatpush3.bf16.msra.mxu1 %v1057_v35  ;;  %v524_v35 = vld [vmem:[%s1663_s5 + $0x88] sm:$0xff] }
 0x111   :  { %1059 = vmatprep.subr.bf16.mxu1 %v1176_v3 }
 0x114   :  { %1061 = vmatpush3.bf16.msra.mxu1 %v1060_v38  ;;  %v1105_v38 = vpack.c.bf16 %v526_v36, %v524_v35 }
 0x115   :  { %1062 = vmatprep.subr.bf16.mxu1 %v1176_v3 }
 0x118   :  { %1064 = vmatpush3.bf16.msra.mxu1 %v1063_v46  ;;  %v529_v46 = vld [vmem:[%s1663_s5 + $0xb0] sm:$0xff] }
 0x119   :  { %1090 = vmatprep.subr.bf16.mxu1 %v1089_v15  ;;  %v1111_v49 = vpack.c.bf16 %v529_v46, %v527_v45 }
 0x1ce   :  { %v214_v40 = vpop.f32.mrb[0].mxu1 }
 0x1cf   :  { %v215_v41 = vadd.f32 %v654_v39, %v214_v40  ;;  %v863_v42 = vpop.f32.mrb[1].mxu1  ;;  %v523_v39 = vld [vmem:[%s1663_s5 + $0x80] sm:$0xff]  ;;  %v525_v40 = vld [vmem:[%s1663_s5 + $0x90] sm:$0xff] }
 0x1d0   :  { %v530_v42 = vld [vmem:[%s1663_s5 + $0xb8] sm:$0xff] }
 0x1d1   :  { %v218_v43 = vmax.f32 %v215_v41, 0.0  ;;  %v528_v41 = vld [vmem:[%s1663_s5 + $0xa8] sm:$0xff] }
 0x1d2   :  { %v1109_v44 = vpack.c.bf16 %v530_v42, %v528_v41 }
 0x1d3   :  { %897 = vmatmul.mubr.f32.vlgmr.msra.gmra.mrb[2].mxu0 %v218_v43  ;;  %v1107_v43 = vpack.c.bf16 %v525_v40, %v523_v39 }
 0x1d4   :  { %966 = vmatprep.mubr.msk.f32.mxu0 %vm1177_vm0, %v1178_v6  ;;  %1067 = vmatpush3.bf16.msra.mxu0 %v1066_v50  ;;  %v1113_v50 = vpack.c.bf16 %v534_v48, %v532_v47 }
 0x1d5   :  { %1068 = vmatprep.subr.bf16.mxu0 %v1176_v3 }
 0x1d8   :  { %1070 = vmatpush3.bf16.msra.mxu0 %v1069_v52  ;;  %v533_v52 = vld [vmem:[%s1663_s5 + $0xd0] sm:$0xff] }
 0x1d9   :  { %1071 = vmatprep.subr.bf16.mxu0 %v1176_v3  ;;  %v1115_v53 = vpack.c.bf16 %v533_v52, %v531_v51 }
 0x1dc   :  { %1073 = vmatpush3.bf16.msra.mxu0 %v1072_v55 }
 0x1dd   :  { %1074 = vmatprep.subr.bf16.mxu0 %v1176_v3 }
 0x1e0   :  { %1076 = vmatpush3.bf16.msra.mxu0 %v1075_v58 }
 0x1e1   :  { %1077 = vmatprep.subr.bf16.mxu0 %v1176_v3 }
 0x1e4   :  { %1079 = vmatpush3.bf16.msra.mxu0 %v1078_v61  ;;  %v1117_v61 = vpack.c.bf16 %v538_v60, %v536_v59 }
 0x1e5   :  { %1080 = vmatprep.subr.bf16.mxu0 %v1176_v3 }
 0x1e8   :  { %1082 = vmatpush3.bf16.msra.mxu0 %v1081_v0  ;;  %v1119_v0 = vpack.c.bf16 %v537_v63, %v535_v62 }
 0x1e9   :  { %1083 = vmatprep.subr.bf16.mxu0 %v1176_v3 }
 0x1ec   :  { %1085 = vmatpush3.bf16.msra.mxu0 %v1084_v4 }
 0x1ed   :  { %1086 = vmatprep.subr.bf16.mxu0 %v1176_v3  ;;  %v1087_v3 = vpack.c.bf16 %v706_v12, %v705_v11  ;;  %v539_v11 = vld [vmem:[%s1664_s6] sm:$0x3] }
 0x1f0   :  { %1088 = vmatpush3.bf16.msra.mxu0 %v1087_v3 }
 0x2a6   :  { %v310_v7 = vpop.f32.mrb[2].mxu0 }
 0x2a7   :  { %v311_v8 = vadd.f32 %v672_v5, %v310_v7  ;;  %v898_v9 = vpop.f32.mrb[3].mxu0 }
 0x2a9   :  { %v314_v10 = vmax.f32 %v311_v8, 0.0  ;;  %v541_v8 = vlaneseq }
 0x2ab   :  { %932 = vmatmul.mubr.f32.vlgmr.msra.gmra.mrb[2].mxu1 %v314_v10  ;;  %v542_v9 = vshrl.u32 %v541_v8, 7 }
 0x2ac   :  { %615 = vmatprep.mubr.f32.mxu1 %v1178_v6  ;;  %v507_v6 = vld [vmem:[%s1663_s5] sm:$0xff]  ;;  %s1179_s5 = smov [#allocation4]  }
 0x2ad   :  { %v1091_v19 = vpack.c.bf16 %v509_v16, %v507_v6  ;;  %v543_v10 = vsub.s32 0, %v542_v9  ;;  %v547_v12 = vsub.s32 1, %v542_v9  ;;  %s641_s21 = sshll.u32 %s1179_s5, 4  ;;  %s642_s21 = int_to_ptr.vmem [resolvable:$true] %s641_s21 }
 0x2ae   :  { %s1128_s4 = scalar_lea.vmem %s642_s21, 128  ;;  %p1133_p1 = scmp.lt.s32.totalorder %s642_s21, %s642_s21 }
 0x2af   :  { %1092 = vmatpush1.bf16.msra.mxu1 %v1091_v19  ;;  %v544_v3 = vrot.slane %v539_v11, %v543_v10  ;;  %v548_v13 = vrot.slane %v539_v11, %v547_v12  ;;  %p1129_p0 = scmp.ne.s32.totalorder %s642_s21, %s1128_s4  ;;  %p1134_p2 = scmp.lt.s32.totalorder %s1128_s4, %s1128_s4 }
 0x2b0   :  { %1094 = vmatprep.subr.bf16.mxu1 %v1093_v20 }
 0x2b1   :  { %p1135_p3 = por %p1134_p2, %p1133_p1 }
 0x2b3   :  { %1096 = vmatpush1.bf16.msra.mxu1 %v1095_v25  ;;  %p1136_p4 = pnand %p1135_p3, %p1129_p0 }
 0x2b4   :  { %1098 = vmatprep.subr.bf16.mxu1 %v1097_v26 }
 0x2b7   :  { %1100 = vmatpush1.bf16.msra.mxu1 %v1099_v31 }
 0x2b8   :  { %1102 = vmatprep.subr.bf16.mxu1 %v1101_v32 }
 0x2bb   :  { %1104 = vmatpush1.bf16.msra.mxu1 %v1103_v37 }
 0x2bc   :  { %1106 = vmatprep.subr.bf16.mxu1 %v1105_v38 }
 0x2bf   :  { %1108 = vmatpush1.bf16.msra.mxu1 %v1107_v43 }
 0x2c0   :  { %1110 = vmatprep.subr.bf16.mxu1 %v1109_v44 }
 0x2c3   :  { %1112 = vmatpush1.bf16.msra.mxu1 %v1111_v49 }
 0x2c4   :  { %1114 = vmatprep.subr.bf16.mxu1 %v1113_v50 }
 0x2c7   :  { %1116 = vmatpush1.bf16.msra.mxu1 %v1115_v53 }
 0x2c8   :  { %1118 = vmatprep.subr.bf16.mxu1 %v1117_v61 }
 0x2cb   :  { %1120 = vmatpush1.bf16.msra.mxu1 %v1119_v0 }
 0x37e   :  { %v406_v55 = vpop.f32.mrb[2].mxu1 }
 0x37f   :  { %v407_v56 = vadd.f32 %v690_v54, %v406_v55  ;;  %v933_v57 = vpop.f32.mrb[3].mxu1 }
 0x381   :  { %v410_v58 = vmax.f32 %v407_v56, 0.0 }
 0x383   :  { %967 = vmatmul.mubr.f32.vlgmr.msra.gmra.mrb[4].mxu0 %v410_v58 }
 0x456   :  { %v502_v2 = vpop.f32.mrb[4].mxu0 }
 0x457   :  { %v503_v4 = vadd.f32 %v708_v1, %v502_v2  ;;  %v968_v5 = vpop.f32.mrb[5].mxu0 }
 0x459   :  { %v506_v7 = vmax.f32 %v503_v4, 0.0 }
 0x45b   :  { %616 = vmatmul.mubr.f32.vlgmr.msra.gmra.mrb[4].mxu1 %v506_v7 }
 0x52e   :  { %v617_v14 = vpop.f32.mrb[4].mxu1 }
 0x52f   :  { %v618_v6 = vadd.f32 %v617_v14, %v544_v3  ;;  %v619_v15 = vpop.f32.mrb[5].mxu1 }
 0x530   :  { %v620_v16 = vadd.f32 %v619_v15, %v548_v13 }
 0x531   :  { %1126 = vtanh.f32 %v618_v6 }
 0x532   :  { %624 = vst [vmem:[#allocation4] sm:$0xff] %v620_v16 }
 0x533   :  { %1139 = shalt.err (!%p1136_p4)
}
 0x534   :  { %s1140_s23 = scalar_lea.hbm %s1666_s8, 128 }
 0x535   :  { %p1141_p5 = scmp.ne.s32.totalorder %s1666_s8, %s1140_s23  ;;  %p1144_p6 = scmp.lt.u32.totalorder %s1140_s23, %s1666_s8 }
 0x537   :  { %p1146_p7 = pnand %p1144_p6, %p1141_p5 }
 0x539   :  { %1149 = shalt.err (!%p1146_p7)
}
 0x53a   :  { %644 = dma.vmem_to_hbm [thread:$0]  %s642_s21, 128, %s1666_s8, [#allocation5]  }
 0x53b   :  { %s1180_s29 = smov [#allocation2]   ;;  %v1127_v17 = vpop.eup %1126 }
 0x53c   :  { %s631_s30 = sshll.u32 %s1180_s29, 4  ;;  %623 = vst [vmem:[#allocation2] sm:$0xff] %v1127_v17  ;;  %s632_s30 = int_to_ptr.vmem [resolvable:$true] %s631_s30 }
 0x53d   :  { %s1150_s9 = scalar_lea.vmem %s632_s30, 128  ;;  %p1155_p9 = scmp.lt.s32.totalorder %s632_s30, %s632_s30 }
 0x53e   :  { %p1151_p8 = scmp.ne.s32.totalorder %s632_s30, %s1150_s9  ;;  %p1156_p10 = scmp.lt.s32.totalorder %s1150_s9, %s1150_s9 }
 0x540   :  { %p1157_p11 = por %p1156_p10, %p1155_p9 }
 0x542   :  { %p1158_p12 = pnand %p1157_p11, %p1151_p8 }
 0x544   :  { %1161 = shalt.err (!%p1158_p12)
}
 0x545   :  { %s1162_s12 = scalar_lea.hbm %s1665_s7, 128 }
 0x546   :  { %p1163_p13 = scmp.ne.s32.totalorder %s1665_s7, %s1162_s12  ;;  %p1166_p0 = scmp.lt.u32.totalorder %s1162_s12, %s1665_s7 }
 0x548   :  { %p1168_p1 = pnand %p1166_p0, %p1163_p13 }
 0x54a   :  { %1171 = shalt.err (!%p1168_p1)
}
 0x54b   :  { %634 = dma.vmem_to_hbm [thread:$0]  %s632_s30, 128, %s1665_s7, [#allocation3]  }
 0x54c   :  { %1172 = dma.done.wait [#allocation3], 128  }
 0x54d   :  { %1173 = vsyncadd [#allocation3], 4294967168 }
 0x54e   :  { %1174 = dma.done.wait [#allocation5], 128  }
 0x54f   :  { %1175 = vsyncadd [#allocation5], 4294967168 }
 0x550   :  { %651 = vsyncpa [#allocation3], 1 }
 0x551   :  { %652 = vsyncpa [#allocation5], 1 }

</bundles_post_ra>
